<compile_context>
chip_gen: v6e
topology: v6e:2x2x1
jax: 0.10.0
libtpu: 0.0.40
codegen_flags: <defaults>
</compile_context>

<pallas_src>
import jax
import jax.numpy as jnp
from jax import lax
from jax.experimental import pallas as pl
from jax.experimental.pallas import tpu as pltpu

N_LAYERS = 8
DIM = 512
LR_MUL = 0.01
W_SCALE = 0.000442
BN_EPS = 1e-5


def mapping_inverse_kernel(x_ref, m_ref, gamma_ref, beta_ref, o_ref):
    # x_ref:     (N, 512)   f32  VMEM
    # m_ref:     (512, 512) bf16 VMEM  -- composed product of the 8 scaled weights
    # gamma_ref: (1, 512)   f32  VMEM
    # beta_ref:  (1, 512)   f32  VMEM
    # o_ref:     (N, 512)        VMEM output
    #
    # Composed linear chain: a single MXU matmul, bf16 inputs, f32 accumulation.
    h = jnp.dot(
        x_ref[...].astype(jnp.bfloat16),
        m_ref[...],
        preferred_element_type=jnp.float32,
    )

    # BatchNorm1d(512), training mode: per-feature batch stats (biased variance).
    # Two-pass statistics (mean, then centered sum-of-squares) for numerical safety.
    inv_n = jnp.float32(1.0 / h.shape[0])
    mean = jnp.sum(h, axis=0, keepdims=True) * inv_n
    centered = h - mean
    var = jnp.sum(centered * centered, axis=0, keepdims=True) * inv_n
    scale = gamma_ref[...] * lax.rsqrt(var + jnp.float32(BN_EPS))
    o_ref[...] = (centered * scale + beta_ref[...]).astype(o_ref.dtype)


def mapping_inverse_forward(x, m_bf16, gamma, beta):
    """x: (N, 512) f32.  m_bf16: (512, 512) bf16 composed weight (see compose_weights).
    gamma/beta: (512,) BatchNorm affine params."""
    n, d = x.shape
    assert d == DIM and m_bf16.shape == (DIM, DIM)
    gamma2 = gamma.reshape(1, DIM).astype(jnp.float32)
    beta2 = beta.reshape(1, DIM).astype(jnp.float32)
    return pl.pallas_call(
        mapping_inverse_kernel,
        out_shape=jax.ShapeDtypeStruct((n, d), x.dtype),
        grid=(1,),  # single step: one matmul + fused BN, no per-step pipeline overhead
        in_specs=[
            pl.BlockSpec((n, d), lambda i: (0, 0)),      # activations
            pl.BlockSpec((DIM, DIM), lambda i: (0, 0)),  # composed weight (0.5 MiB bf16)
            pl.BlockSpec((1, DIM), lambda i: (0, 0)),    # gamma
            pl.BlockSpec((1, DIM), lambda i: (0, 0)),    # beta
        ],
        out_specs=pl.BlockSpec((n, d), lambda i: (0, 0)),
        compiler_params=pltpu.CompilerParams(dimension_semantics=("arbitrary",)),
    )(x, m_bf16, gamma2, beta2)


def init_params(key):
    # EqualLinear_inverse weights: torch.randn(out_dim, in_dim).div_(lr_mul), 8 layers.
    w = jax.random.normal(key, (N_LAYERS, DIM, DIM), dtype=jnp.float32) / LR_MUL
    # BatchNorm1d affine params at their defaults.
    gamma = jnp.ones((DIM,), dtype=jnp.float32)
    beta = jnp.zeros((DIM,), dtype=jnp.float32)
    return w, gamma, beta


def compose_weights(w_stack_f32):
    """ONE-TIME setup (weights are frozen): compose the 8 pure-linear layers.

    h @ (s*W_1).T @ (s*W_2).T @ ... @ (s*W_8).T  ==  h @ M,  M = prod_i (s * W_i.T).
    Composition and the W_SCALE fold are done in f32 HIGHEST precision; a single
    bf16 cast happens at the end (vs 8 chained bf16 roundings in a per-layer kernel).
    """
    m = jnp.eye(DIM, dtype=jnp.float32)
    for i in range(N_LAYERS):
        m = jnp.dot(m, W_SCALE * w_stack_f32[i].T, precision=lax.Precision.HIGHEST)
    return m.astype(jnp.bfloat16)


def reference_forward(x, w_stack_f32, gamma, beta):
    # Clean per-layer f32 reference of the module's forward pass.
    h = x.astype(jnp.float32)
    for i in range(N_LAYERS):
        h = jnp.dot(h, (W_SCALE * w_stack_f32[i]).T, precision=lax.Precision.HIGHEST)
    mean = jnp.mean(h, axis=0, keepdims=True)
    var = jnp.mean((h - mean) ** 2, axis=0, keepdims=True)  # biased variance
    return (h - mean) / jnp.sqrt(var + BN_EPS) * gamma[None, :] + beta[None, :]


if __name__ == "__main__":
    key = jax.random.PRNGKey(0)
    k_x, k_p = jax.random.split(key)

    batch = 4  # BatchNorm1d(512) expects (N, 512); N >= 2 for meaningful batch stats
    x = jax.random.normal(k_x, (batch, DIM), dtype=jnp.float32)
    w_stack, gamma, beta = init_params(k_p)

    # One-time setup: compose frozen linear chain into a single bf16 matrix.
    m_bf16 = jax.block_until_ready(compose_weights(w_stack))

    out = jax.block_until_ready(mapping_inverse_forward(x, m_bf16, gamma, beta))

    ref = reference_forward(x, w_stack, gamma, beta)
    assert out.shape == (batch, DIM)
    # Single bf16 rounding of the composed weight + bf16 MXU input cast.
    assert jnp.allclose(out, ref, atol=5e-2, rtol=5e-2), "mismatch vs JAX reference"

    print("KERNEL_OK")
</pallas_src>

<mosaic_0001>
module attributes {stable_mosaic.version = 11 : i64} {
  func.func @mapping_inverse_kernel(%arg0: i32, %arg1: memref<4x512xf32, #tpu.memory_space<vmem>>, %arg2: memref<512x512xbf16, #tpu.memory_space<vmem>>, %arg3: memref<1x512xf32, #tpu.memory_space<vmem>>, %arg4: memref<1x512xf32, #tpu.memory_space<vmem>>, %arg5: memref<4x512xf32, #tpu.memory_space<vmem>>) attributes {dimension_semantics = [#tpu.dimension_semantics<arbitrary>], iteration_bounds = array<i64: 1>, scalar_prefetch = 0 : i64, scratch_operands = 0 : i64, tpu.core_type = #tpu.core_type<tc>, window_params = [{pipeline_mode = #tpu.pipeline_mode<synchronous>, transform_indices = @transform_0, window_bounds = array<i64: 4, 512>}, {pipeline_mode = #tpu.pipeline_mode<synchronous>, transform_indices = @transform_1, window_bounds = array<i64: 512, 512>}, {pipeline_mode = #tpu.pipeline_mode<synchronous>, transform_indices = @transform_2, window_bounds = array<i64: 1, 512>}, {pipeline_mode = #tpu.pipeline_mode<synchronous>, transform_indices = @transform_3, window_bounds = array<i64: 1, 512>}, {pipeline_mode = #tpu.pipeline_mode<synchronous>, transform_indices = @transform_4, window_bounds = array<i64: 4, 512>}]} {
    %c0 = arith.constant 0 : index
    %c0_0 = arith.constant 0 : index
    %0 = vector.load %arg1[%c0, %c0_0] : memref<4x512xf32, #tpu.memory_space<vmem>>, vector<4x512xf32>
    %1 = arith.truncf %0 : vector<4x512xf32> to vector<4x512xbf16>
    %c0_1 = arith.constant 0 : index
    %c0_2 = arith.constant 0 : index
    %2 = vector.load %arg2[%c0_1, %c0_2] : memref<512x512xbf16, #tpu.memory_space<vmem>>, vector<512x512xbf16>
    %cst = arith.constant dense<0.000000e+00> : vector<4x512xf32>
    %3 = tpu.matmul %1, %2, %cst {dimension_numbers = #tpu.dot_dimension_numbers<[1], [0], [0], [1], [0, 0, 1, 1], [], []>} : vector<4x512xbf16>, vector<512x512xbf16>, vector<4x512xf32> -> vector<4x512xf32>
    %cst_3 = arith.constant dense<0.000000e+00> : vector<512xf32>
    %4 = vector.multi_reduction <add>, %3, %cst_3 [0] : vector<4x512xf32> to vector<512xf32>
    %5 = vector.shape_cast %4 : vector<512xf32> to vector<1x512xf32>
    %cst_4 = arith.constant 2.500000e-01 : f32
    %6 = vector.broadcast %cst_4 : f32 to vector<1x512xf32>
    %7 = arith.mulf %5, %6 : vector<1x512xf32>
    %8 = vector.broadcast %7 : vector<1x512xf32> to vector<4x512xf32>
    %9 = arith.subf %3, %8 : vector<4x512xf32>
    %10 = arith.mulf %9, %9 : vector<4x512xf32>
    %cst_5 = arith.constant dense<0.000000e+00> : vector<512xf32>
    %11 = vector.multi_reduction <add>, %10, %cst_5 [0] : vector<4x512xf32> to vector<512xf32>
    %12 = vector.shape_cast %11 : vector<512xf32> to vector<1x512xf32>
    %cst_6 = arith.constant 2.500000e-01 : f32
    %13 = vector.broadcast %cst_6 : f32 to vector<1x512xf32>
    %14 = arith.mulf %12, %13 : vector<1x512xf32>
    %c0_7 = arith.constant 0 : index
    %c0_8 = arith.constant 0 : index
    %15 = vector.load %arg3[%c0_7, %c0_8] : memref<1x512xf32, #tpu.memory_space<vmem>>, vector<1x512xf32>
    %cst_9 = arith.constant 9.99999974E-6 : f32
    %16 = vector.broadcast %cst_9 : f32 to vector<1x512xf32>
    %17 = arith.addf %14, %16 : vector<1x512xf32>
    %18 = math.rsqrt %17 : vector<1x512xf32>
    %19 = arith.mulf %15, %18 : vector<1x512xf32>
    %20 = vector.broadcast %19 : vector<1x512xf32> to vector<4x512xf32>
    %21 = arith.mulf %9, %20 : vector<4x512xf32>
    %c0_10 = arith.constant 0 : index
    %c0_11 = arith.constant 0 : index
    %22 = vector.load %arg4[%c0_10, %c0_11] : memref<1x512xf32, #tpu.memory_space<vmem>>, vector<1x512xf32>
    %23 = vector.broadcast %22 : vector<1x512xf32> to vector<4x512xf32>
    %24 = arith.addf %21, %23 : vector<4x512xf32>
    %c0_12 = arith.constant 0 : index
    %c0_13 = arith.constant 0 : index
    %25 = vector.load %arg5[%c0_12, %c0_13] : memref<4x512xf32, #tpu.memory_space<vmem>>, vector<4x512xf32>
    tpu.vector_store %arg5[%c0_12, %c0_13], %24 {strides = array<i32>} : memref<4x512xf32, #tpu.memory_space<vmem>>, vector<4x512xf32>,
    return
  }
  func.func @transform_0(%arg0: i32) -> (i32, i32) {
    %c0_i32 = arith.constant 0 : i32
    %c0_i32_0 = arith.constant 0 : i32
    %c0_i32_1 = arith.constant 0 : i32
    return %c0_i32, %c0_i32_0 : i32, i32
  }
  func.func @transform_1(%arg0: i32) -> (i32, i32) {
    %c0_i32 = arith.constant 0 : i32
    %c0_i32_0 = arith.constant 0 : i32
    %c0_i32_1 = arith.constant 0 : i32
    return %c0_i32, %c0_i32_0 : i32, i32
  }
  func.func @transform_2(%arg0: i32) -> (i32, i32) {
    %c0_i32 = arith.constant 0 : i32
    %c0_i32_0 = arith.constant 0 : i32
    %c0_i32_1 = arith.constant 0 : i32
    return %c0_i32, %c0_i32_0 : i32, i32
  }
  func.func @transform_3(%arg0: i32) -> (i32, i32) {
    %c0_i32 = arith.constant 0 : i32
    %c0_i32_0 = arith.constant 0 : i32
    %c0_i32_1 = arith.constant 0 : i32
    return %c0_i32, %c0_i32_0 : i32, i32
  }
  func.func @transform_4(%arg0: i32) -> (i32, i32) {
    %c0_i32 = arith.constant 0 : i32
    %c0_i32_0 = arith.constant 0 : i32
    %c0_i32_1 = arith.constant 0 : i32
    return %c0_i32, %c0_i32_0 : i32, i32
  }
}

</mosaic_0001>

<bundles_post_ra>
// kernel: tpu_custom_call.1
= control target key start
LH: loop header
LB: loop body
LE: loop exit
PB: predicated region body
PF: predicated region fallthrough
CT: control target
= control target key end

     0   :  { %9 = vsyncpa [#allocation3], 0  ;;  %s1687_s0 = inlined_call_operand.hbm [shape: f32[4,512], index: 0, kind: input, shape index: {}]   ;;  %s1688_s1 = inlined_call_operand.hbm [shape: bf16[512,512], index: 1, kind: input, shape index: {}]   ;;  %s1689_s2 = inlined_call_operand.hbm [shape: f32[1,512], index: 2, kind: input, shape index: {}]   ;;  %s1690_s3 = inlined_call_operand.vmem [shape: f32[1,512], index: 3, kind: input, shape index: {}]   ;;  %s1691_s4 = inlined_call_operand.hbm [shape: f32[4,512], index: 4, kind: output, shape index: {}]  }
   0x1   :  { %10 = vsyncpa [#allocation6], 0 }
   0x2   :  { %11 = vsyncpa [#allocation4], 0  ;;  %s1611_s15 = smov [#allocation5]  }
   0x3   :  { %s27_s16 = sshll.u32 %s1611_s15, 4  ;;  %s28_s16 = int_to_ptr.vmem [resolvable:$true] %s27_s16 }
   0x4   :  { %s1533_s17 = scalar_lea.vmem %s28_s16, 16384  ;;  %p1538_p1 = scmp.lt.s32.totalorder %s28_s16, %s28_s16 }
   0x5   :  { %p1534_p0 = scmp.ne.s32.totalorder %s28_s16, %s1533_s17  ;;  %p1539_p2 = scmp.lt.s32.totalorder %s1533_s17, %s1533_s17 }
   0x7   :  { %p1540_p3 = por %p1539_p2, %p1538_p1 }
   0x9   :  { %p1541_p4 = pnand %p1540_p3, %p1534_p0 }
   0xb   :  { %1544 = shalt.err (!%p1541_p4)
}
   0xc   :  { %s1612_s18 = smov 256   ;;  %s1613_s19 = smov 16  }
   0xd   :  { %33 = dma.hbm_to_vmem [thread:$0]  %s1688_s1, 16384, %s28_s16, [#allocation6], %s1612_s18, %s1612_s18, %s1613_s19  }
   0xe   :  { %s1614_s22 = smov [#allocation2]   ;;  %s1615_s24 = smov [#allocation7]  }
   0xf   :  { %s18_s23 = sshll.u32 %s1614_s22, 4  ;;  %s40_s25 = sshll.u32 %s1615_s24, 4  ;;  %s19_s23 = int_to_ptr.vmem [resolvable:$true] %s18_s23  ;;  %s41_s25 = int_to_ptr.vmem [resolvable:$true] %s40_s25 }
  0x10   :  { %s1553_s26 = scalar_lea.vmem %s19_s23, 256  ;;  %p1558_p6 = scmp.lt.s32.totalorder %s19_s23, %s19_s23 }
  0x11   :  { %p1554_p5 = scmp.ne.s32.totalorder %s19_s23, %s1553_s26  ;;  %p1559_p7 = scmp.lt.s32.totalorder %s1553_s26, %s1553_s26 }
  0x13   :  { %p1560_p8 = por %p1559_p7, %p1558_p6 }
  0x15   :  { %p1561_p9 = pnand %p1560_p8, %p1554_p5 }
  0x17   :  { %1564 = shalt.err (!%p1561_p9)
}
  0x18   :  { %21 = dma.hbm_to_vmem [thread:$0]  %s1687_s0, 256, %s19_s23, [#allocation3]  }
  0x19   :  { %s1573_s29 = scalar_lea.vmem %s41_s25, 64  ;;  %p1578_p11 = scmp.lt.s32.totalorder %s41_s25, %s41_s25 }
  0x1a   :  { %p1574_p10 = scmp.ne.s32.totalorder %s41_s25, %s1573_s29  ;;  %p1579_p12 = scmp.lt.s32.totalorder %s1573_s29, %s1573_s29 }
  0x1c   :  { %p1580_p13 = por %p1579_p12, %p1578_p11 }
  0x1e   :  { %p1581_p0 = pnand %p1580_p13, %p1574_p10 }
  0x20   :  { %1584 = shalt.err (!%p1581_p0)
}
  0x21   :  { %43 = dma.hbm_to_vmem [thread:$0]  %s1689_s2, 64, %s41_s25, [#allocation6]  }
  0x22   :  { %1605 = dma.done.wait [#allocation3], 256  }
  0x23   :  { %1606 = vsyncadd [#allocation3], 4294967040 }
  0x24   :  { %1607 = dma.done.wait [#allocation6], 16448  }
  0x25   :  { %1608 = vsyncadd [#allocation6], 4294950848  ;;  %v1323_v0 = vld [vmem:[#allocation5 + $0xe4] ss:$16 sps:$4 sm:$0xff]   ;;  %v1327_v2 = vld [vmem:[#allocation5 + $0xe0] ss:$16 sps:$4 sm:$0xff]  }
  0x26   :  { %v1325_v1 = vld [vmem:[#allocation5 + $0x2e4] ss:$16 sps:$4 sm:$0xff]   ;;  %835 = vmatprep.subr.bf16.mxu0 %v1323_v0  ;;  %v1328_v3 = vld [vmem:[#allocation5 + $0x2e0] ss:$16 sps:$4 sm:$0xff]   ;;  %v56_v48 = vld [vmem:[#allocation2 + $0x8] sm:$0xff]  ;;  %vm999_vm0 = vcmask 1043456  }
  0x27   :  { %876 = vmatprep.subr.bf16.mxu1 %v1325_v1  ;;  %v1329_v4 = vld [vmem:[#allocation5 + $0xc4] ss:$16 sps:$4 sm:$0xff]   ;;  %836 = vmatpush1.bf16.msra.mxu0 %v1327_v2  ;;  %v1333_v6 = vld [vmem:[#allocation5 + $0xc0] ss:$16 sps:$4 sm:$0xff]   ;;  %v60_v51 = vcombine.high %v56_v48, %v56_v48  ;;  %s1617_s5 = smov [#allocation8]  }
  0x28   :  { %877 = vmatpush1.bf16.msra.mxu1 %v1328_v3  ;;  %v1331_v5 = vld [vmem:[#allocation5 + $0x2c4] ss:$16 sps:$4 sm:$0xff]   ;;  %837 = vmatprep.subr.bf16.mxu0 %v1329_v4  ;;  %v1334_v7 = vld [vmem:[#allocation5 + $0x2c0] ss:$16 sps:$4 sm:$0xff]  }
  0x29   :  { %878 = vmatprep.subr.bf16.mxu1 %v1331_v5  ;;  %v1335_v8 = vld [vmem:[#allocation5 + $0xa4] ss:$16 sps:$4 sm:$0xff]   ;;  %v1339_v10 = vld [vmem:[#allocation5 + $0xa0] ss:$16 sps:$4 sm:$0xff]   ;;  %v66_v55 = vpack.c.bf16 %v60_v51, %v60_v51  ;;  %v1484_v51 = vld [vmem:[#allocation5 + $0x3a8] ss:$16 sps:$4 sm:$0xff]  }
  0x2a   :  { %v1337_v9 = vld [vmem:[#allocation5 + $0x2a4] ss:$16 sps:$4 sm:$0xff]   ;;  %v1340_v11 = vld [vmem:[#allocation5 + $0x2a0] ss:$16 sps:$4 sm:$0xff]  }
  0x2b   :  { %838 = vmatpush1.bf16.msra.mxu0 %v1333_v6  ;;  %v1341_v12 = vld [vmem:[#allocation5 + $0x84] ss:$16 sps:$4 sm:$0xff]   ;;  %v1345_v14 = vld [vmem:[#allocation5 + $0x80] ss:$16 sps:$4 sm:$0xff]   ;;  %908 = vmatprep.mubr.bf16.mxu1 %v66_v55  ;;  %v1423_v6 = vld [vmem:[#allocation5 + $0xec] ss:$16 sps:$4 sm:$0xff]  }
  0x2c   :  { %879 = vmatpush1.bf16.msra.mxu1 %v1334_v7  ;;  %839 = vmatprep.subr.bf16.mxu0 %v1335_v8  ;;  %v1343_v13 = vld [vmem:[#allocation5 + $0x284] ss:$16 sps:$4 sm:$0xff]   ;;  %v1346_v15 = vld [vmem:[#allocation5 + $0x280] ss:$16 sps:$4 sm:$0xff]   ;;  %v1426_v7 = vld [vmem:[#allocation5 + $0x2ec] ss:$16 sps:$4 sm:$0xff]  }
  0x2d   :  { %880 = vmatprep.subr.bf16.mxu1 %v1337_v9  ;;  %v1347_v16 = vld [vmem:[#allocation5 + $0x64] ss:$16 sps:$4 sm:$0xff]   ;;  %v1351_v18 = vld [vmem:[#allocation5 + $0x60] ss:$16 sps:$4 sm:$0xff]   ;;  %v1654_v9 = vpack.c.bf16 %v56_v48, %v56_v48  ;;  %v1483_v48 = vld [vmem:[#allocation5 + $0x1ac] ss:$16 sps:$4 sm:$0xff]  }
  0x2e   :  { %v1349_v17 = vld [vmem:[#allocation5 + $0x264] ss:$16 sps:$4 sm:$0xff]   ;;  %v1352_v19 = vld [vmem:[#allocation5 + $0x260] ss:$16 sps:$4 sm:$0xff]  }
  0x2f   :  { %840 = vmatpush1.bf16.msra.mxu0 %v1339_v10  ;;  %v1353_v20 = vld [vmem:[#allocation5 + $0x44] ss:$16 sps:$4 sm:$0xff]   ;;  %v1357_v22 = vld [vmem:[#allocation5 + $0x40] ss:$16 sps:$4 sm:$0xff]   ;;  %v1421_v10 = vld [vmem:[#allocation5 + $0xe8] ss:$16 sps:$4 sm:$0xff]  }
  0x30   :  { %881 = vmatpush1.bf16.msra.mxu1 %v1340_v11  ;;  %841 = vmatprep.subr.bf16.mxu0 %v1341_v12  ;;  %v1355_v21 = vld [vmem:[#allocation5 + $0x244] ss:$16 sps:$4 sm:$0xff]   ;;  %v1358_v23 = vld [vmem:[#allocation5 + $0x240] ss:$16 sps:$4 sm:$0xff]   ;;  %v1424_v11 = vld [vmem:[#allocation5 + $0x2e8] ss:$16 sps:$4 sm:$0xff]  }
  0x31   :  { %882 = vmatprep.subr.bf16.mxu1 %v1343_v13  ;;  %v1359_v24 = vld [vmem:[#allocation5 + $0x24] ss:$16 sps:$4 sm:$0xff]   ;;  %v1363_v26 = vld [vmem:[#allocation5 + $0x20] ss:$16 sps:$4 sm:$0xff]   ;;  %v1429_v12 = vld [vmem:[#allocation5 + $0xcc] ss:$16 sps:$4 sm:$0xff]  }
  0x32   :  { %v1361_v25 = vld [vmem:[#allocation5 + $0x224] ss:$16 sps:$4 sm:$0xff]   ;;  %v1364_v27 = vld [vmem:[#allocation5 + $0x220] ss:$16 sps:$4 sm:$0xff]   ;;  %v1432_v13 = vld [vmem:[#allocation5 + $0x2cc] ss:$16 sps:$4 sm:$0xff]  }
  0x33   :  { %842 = vmatpush1.bf16.msra.mxu0 %v1345_v14  ;;  %v1365_v28 = vld [vmem:[#allocation5 + $0x4] ss:$16 sps:$4 sm:$0xff]   ;;  %v1369_v30 = vld [vmem:[#allocation5] ss:$16 sps:$4 sm:$0xff]   ;;  %v1427_v14 = vld [vmem:[#allocation5 + $0xc8] ss:$16 sps:$4 sm:$0xff]  }
  0x34   :  { %883 = vmatpush1.bf16.msra.mxu1 %v1346_v15  ;;  %843 = vmatprep.subr.bf16.mxu0 %v1347_v16  ;;  %v1367_v29 = vld [vmem:[#allocation5 + $0x204] ss:$16 sps:$4 sm:$0xff]   ;;  %v1370_v31 = vld [vmem:[#allocation5 + $0x200] ss:$16 sps:$4 sm:$0xff]   ;;  %v1430_v15 = vld [vmem:[#allocation5 + $0x2c8] ss:$16 sps:$4 sm:$0xff]  }
  0x35   :  { %884 = vmatprep.subr.bf16.mxu1 %v1349_v17  ;;  %v1371_v32 = vld [vmem:[#allocation5 + $0x1e4] ss:$16 sps:$4 sm:$0xff]   ;;  %v1375_v34 = vld [vmem:[#allocation5 + $0x1e0] ss:$16 sps:$4 sm:$0xff]   ;;  %v1435_v16 = vld [vmem:[#allocation5 + $0xac] ss:$16 sps:$4 sm:$0xff]  }
  0x36   :  { %v1373_v33 = vld [vmem:[#allocation5 + $0x3e4] ss:$16 sps:$4 sm:$0xff]   ;;  %v1376_v35 = vld [vmem:[#allocation5 + $0x3e0] ss:$16 sps:$4 sm:$0xff]   ;;  %v1438_v17 = vld [vmem:[#allocation5 + $0x2ac] ss:$16 sps:$4 sm:$0xff]  }
  0x37   :  { %844 = vmatpush1.bf16.msra.mxu0 %v1351_v18  ;;  %v1377_v36 = vld [vmem:[#allocation5 + $0x1c4] ss:$16 sps:$4 sm:$0xff]   ;;  %v1381_v38 = vld [vmem:[#allocation5 + $0x1c0] ss:$16 sps:$4 sm:$0xff]   ;;  %v1433_v18 = vld [vmem:[#allocation5 + $0xa8] ss:$16 sps:$4 sm:$0xff]  }
  0x38   :  { %885 = vmatpush1.bf16.msra.mxu1 %v1352_v19  ;;  %845 = vmatprep.subr.bf16.mxu0 %v1353_v20  ;;  %v1379_v37 = vld [vmem:[#allocation5 + $0x3c4] ss:$16 sps:$4 sm:$0xff]   ;;  %v1382_v39 = vld [vmem:[#allocation5 + $0x3c0] ss:$16 sps:$4 sm:$0xff]   ;;  %v1436_v19 = vld [vmem:[#allocation5 + $0x2a8] ss:$16 sps:$4 sm:$0xff]  }
  0x39   :  { %886 = vmatprep.subr.bf16.mxu1 %v1355_v21  ;;  %v1383_v40 = vld [vmem:[#allocation5 + $0x1a4] ss:$16 sps:$4 sm:$0xff]   ;;  %v1387_v42 = vld [vmem:[#allocation5 + $0x1a0] ss:$16 sps:$4 sm:$0xff]   ;;  %v1441_v20 = vld [vmem:[#allocation5 + $0x8c] ss:$16 sps:$4 sm:$0xff]  }
  0x3a   :  { %v1385_v41 = vld [vmem:[#allocation5 + $0x3a4] ss:$16 sps:$4 sm:$0xff]   ;;  %v1388_v43 = vld [vmem:[#allocation5 + $0x3a0] ss:$16 sps:$4 sm:$0xff]   ;;  %v1444_v21 = vld [vmem:[#allocation5 + $0x28c] ss:$16 sps:$4 sm:$0xff]  }
  0x3b   :  { %846 = vmatpush1.bf16.msra.mxu0 %v1357_v22  ;;  %v1389_v44 = vld [vmem:[#allocation5 + $0x184] ss:$16 sps:$4 sm:$0xff]   ;;  %v1393_v49 = vld [vmem:[#allocation5 + $0x180] ss:$16 sps:$4 sm:$0xff]   ;;  %v1439_v22 = vld [vmem:[#allocation5 + $0x88] ss:$16 sps:$4 sm:$0xff]  }
  0x3c   :  { %887 = vmatpush1.bf16.msra.mxu1 %v1358_v23  ;;  %847 = vmatprep.subr.bf16.mxu0 %v1359_v24  ;;  %v1391_v45 = vld [vmem:[#allocation5 + $0x384] ss:$16 sps:$4 sm:$0xff]   ;;  %v1394_v50 = vld [vmem:[#allocation5 + $0x380] ss:$16 sps:$4 sm:$0xff]   ;;  %v1442_v23 = vld [vmem:[#allocation5 + $0x288] ss:$16 sps:$4 sm:$0xff]  }
  0x3d   :  { %888 = vmatprep.subr.bf16.mxu1 %v1361_v25  ;;  %v55_v46 = vld [vmem:[#allocation2] sm:$0xff]  ;;  %v1447_v24 = vld [vmem:[#allocation5 + $0x6c] ss:$16 sps:$4 sm:$0xff]  }
  0x3e   :  { %v59_v47 = vcombine.high %v55_v46, %v55_v46  ;;  %v1395_v52 = vld [vmem:[#allocation5 + $0x164] ss:$16 sps:$4 sm:$0xff]   ;;  %v1399_v56 = vld [vmem:[#allocation5 + $0x160] ss:$16 sps:$4 sm:$0xff]   ;;  %v1652_v8 = vpack.c.bf16 %v55_v46, %v55_v46  ;;  %v1450_v25 = vld [vmem:[#allocation5 + $0x26c] ss:$16 sps:$4 sm:$0xff]  }
  0x3f   :  { %848 = vmatpush1.bf16.msra.mxu0 %v1363_v26  ;;  %v1397_v53 = vld [vmem:[#allocation5 + $0x364] ss:$16 sps:$4 sm:$0xff]   ;;  %v1400_v57 = vld [vmem:[#allocation5 + $0x360] ss:$16 sps:$4 sm:$0xff]   ;;  %v1445_v26 = vld [vmem:[#allocation5 + $0x68] ss:$16 sps:$4 sm:$0xff]  }
  0x40   :  { %889 = vmatpush1.bf16.msra.mxu1 %v1364_v27  ;;  %849 = vmatprep.subr.bf16.mxu0 %v1365_v28  ;;  %v64_v54 = vpack.c.bf16 %v59_v47, %v59_v47  ;;  %v1401_v58 = vld [vmem:[#allocation5 + $0x144] ss:$16 sps:$4 sm:$0xff]   ;;  %v1405_v60 = vld [vmem:[#allocation5 + $0x140] ss:$16 sps:$4 sm:$0xff]   ;;  %v1448_v27 = vld [vmem:[#allocation5 + $0x268] ss:$16 sps:$4 sm:$0xff]  }
  0x41   :  { %890 = vmatprep.subr.bf16.mxu1 %v1367_v29  ;;  %v1403_v59 = vld [vmem:[#allocation5 + $0x344] ss:$16 sps:$4 sm:$0xff]   ;;  %v1406_v61 = vld [vmem:[#allocation5 + $0x340] ss:$16 sps:$4 sm:$0xff]   ;;  %v1453_v28 = vld [vmem:[#allocation5 + $0x4c] ss:$16 sps:$4 sm:$0xff]  }
  0x42   :  { %867 = vmatprep.mubr.bf16.mxu0 %v64_v54  ;;  %v1407_v62 = vld [vmem:[#allocation5 + $0x124] ss:$16 sps:$4 sm:$0xff]   ;;  %v1411_v0 = vld [vmem:[#allocation5 + $0x120] ss:$16 sps:$4 sm:$0xff]   ;;  %v1456_v29 = vld [vmem:[#allocation5 + $0x24c] ss:$16 sps:$4 sm:$0xff]  }
  0x43   :  { %850 = vmatpush1.bf16.msra.mxu0 %v1369_v30  ;;  %v1409_v63 = vld [vmem:[#allocation5 + $0x324] ss:$16 sps:$4 sm:$0xff]   ;;  %v1412_v1 = vld [vmem:[#allocation5 + $0x320] ss:$16 sps:$4 sm:$0xff]   ;;  %v1451_v30 = vld [vmem:[#allocation5 + $0x48] ss:$16 sps:$4 sm:$0xff]  }
  0x44   :  { %891 = vmatpush1.bf16.msra.mxu1 %v1370_v31  ;;  %851 = vmatprep.subr.bf16.mxu0 %v1371_v32  ;;  %v1413_v2 = vld [vmem:[#allocation5 + $0x104] ss:$16 sps:$4 sm:$0xff]   ;;  %v1417_v4 = vld [vmem:[#allocation5 + $0x100] ss:$16 sps:$4 sm:$0xff]   ;;  %v1454_v31 = vld [vmem:[#allocation5 + $0x248] ss:$16 sps:$4 sm:$0xff]  }
  0x45   :  { %892 = vmatprep.subr.bf16.mxu1 %v1373_v33  ;;  %v1415_v3 = vld [vmem:[#allocation5 + $0x304] ss:$16 sps:$4 sm:$0xff]   ;;  %v1418_v5 = vld [vmem:[#allocation5 + $0x300] ss:$16 sps:$4 sm:$0xff]   ;;  %v1459_v32 = vld [vmem:[#allocation5 + $0x2c] ss:$16 sps:$4 sm:$0xff]  }
  0x46   :  { %v1462_v33 = vld [vmem:[#allocation5 + $0x22c] ss:$16 sps:$4 sm:$0xff]   ;;  %v1475_v46 = vld [vmem:[#allocation5 + $0x1c8] ss:$16 sps:$4 sm:$0xff]  }
  0x47   :  { %852 = vmatpush2.bf16.msra.mxu0 %v1375_v34  ;;  %v1457_v34 = vld [vmem:[#allocation5 + $0x28] ss:$16 sps:$4 sm:$0xff]  }
  0x48   :  { %893 = vmatpush2.bf16.msra.mxu1 %v1376_v35  ;;  %853 = vmatprep.subr.bf16.mxu0 %v1377_v36  ;;  %v1460_v35 = vld [vmem:[#allocation5 + $0x228] ss:$16 sps:$4 sm:$0xff]   ;;  %v1465_v36 = vld [vmem:[#allocation5 + $0xc] ss:$16 sps:$4 sm:$0xff]  }
  0x49   :  { %894 = vmatprep.subr.bf16.mxu1 %v1379_v37  ;;  %v1468_v37 = vld [vmem:[#allocation5 + $0x20c] ss:$16 sps:$4 sm:$0xff]   ;;  %v1478_v47 = vld [vmem:[#allocation5 + $0x3c8] ss:$16 sps:$4 sm:$0xff]  }
  0x4b   :  { %854 = vmatpush2.bf16.msra.mxu0 %v1381_v38  ;;  %v1463_v38 = vld [vmem:[#allocation5 + $0x8] ss:$16 sps:$4 sm:$0xff]  }
  0x4c   :  { %895 = vmatpush2.bf16.msra.mxu1 %v1382_v39  ;;  %855 = vmatprep.subr.bf16.mxu0 %v1383_v40  ;;  %v1466_v39 = vld [vmem:[#allocation5 + $0x208] ss:$16 sps:$4 sm:$0xff]   ;;  %v1471_v40 = vld [vmem:[#allocation5 + $0x1ec] ss:$16 sps:$4 sm:$0xff]  }
  0x4d   :  { %896 = vmatprep.subr.bf16.mxu1 %v1385_v41  ;;  %v1474_v41 = vld [vmem:[#allocation5 + $0x3ec] ss:$16 sps:$4 sm:$0xff]  }
  0x4f   :  { %856 = vmatpush2.bf16.msra.mxu0 %v1387_v42  ;;  %v1469_v42 = vld [vmem:[#allocation5 + $0x1e8] ss:$16 sps:$4 sm:$0xff]  }
  0x50   :  { %897 = vmatpush2.bf16.msra.mxu1 %v1388_v43  ;;  %857 = vmatprep.subr.bf16.mxu0 %v1389_v44  ;;  %v1472_v43 = vld [vmem:[#allocation5 + $0x3e8] ss:$16 sps:$4 sm:$0xff]   ;;  %v1477_v44 = vld [vmem:[#allocation5 + $0x1cc] ss:$16 sps:$4 sm:$0xff]  }
  0x51   :  { %898 = vmatprep.subr.bf16.mxu1 %v1391_v45  ;;  %v1480_v45 = vld [vmem:[#allocation5 + $0x3cc] ss:$16 sps:$4 sm:$0xff]  }
  0x53   :  { %858 = vmatpush2.bf16.msra.mxu0 %v1393_v49  ;;  %v1486_v49 = vld [vmem:[#allocation5 + $0x3ac] ss:$16 sps:$4 sm:$0xff]  }
  0x54   :  { %899 = vmatpush2.bf16.msra.mxu1 %v1394_v50  ;;  %859 = vmatprep.subr.bf16.mxu0 %v1395_v52  ;;  %v1481_v50 = vld [vmem:[#allocation5 + $0x1a8] ss:$16 sps:$4 sm:$0xff]   ;;  %v1489_v52 = vld [vmem:[#allocation5 + $0x18c] ss:$16 sps:$4 sm:$0xff]  }
  0x55   :  { %900 = vmatprep.subr.bf16.mxu1 %v1397_v53  ;;  %v1492_v53 = vld [vmem:[#allocation5 + $0x38c] ss:$16 sps:$4 sm:$0xff]  }
  0x57   :  { %860 = vmatpush2.bf16.msra.mxu0 %v1399_v56  ;;  %v1495_v56 = vld [vmem:[#allocation5 + $0x16c] ss:$16 sps:$4 sm:$0xff]  }
  0x58   :  { %901 = vmatpush2.bf16.msra.mxu1 %v1400_v57  ;;  %861 = vmatprep.subr.bf16.mxu0 %v1401_v58  ;;  %v1498_v57 = vld [vmem:[#allocation5 + $0x36c] ss:$16 sps:$4 sm:$0xff]   ;;  %v1493_v58 = vld [vmem:[#allocation5 + $0x168] ss:$16 sps:$4 sm:$0xff]  }
  0x59   :  { %902 = vmatprep.subr.bf16.mxu1 %v1403_v59  ;;  %v1496_v59 = vld [vmem:[#allocation5 + $0x368] ss:$16 sps:$4 sm:$0xff]  }
  0x5b   :  { %862 = vmatpush2.bf16.msra.mxu0 %v1405_v60  ;;  %v1501_v60 = vld [vmem:[#allocation5 + $0x14c] ss:$16 sps:$4 sm:$0xff]  }
  0x5c   :  { %903 = vmatpush2.bf16.msra.mxu1 %v1406_v61  ;;  %863 = vmatprep.subr.bf16.mxu0 %v1407_v62  ;;  %v1504_v61 = vld [vmem:[#allocation5 + $0x34c] ss:$16 sps:$4 sm:$0xff]   ;;  %v1499_v62 = vld [vmem:[#allocation5 + $0x148] ss:$16 sps:$4 sm:$0xff]  }
  0x5d   :  { %904 = vmatprep.subr.bf16.mxu1 %v1409_v63  ;;  %v1502_v63 = vld [vmem:[#allocation5 + $0x348] ss:$16 sps:$4 sm:$0xff]  }
  0x5f   :  { %864 = vmatpush2.bf16.msra.mxu0 %v1411_v0  ;;  %v1507_v0 = vld [vmem:[#allocation5 + $0x12c] ss:$16 sps:$4 sm:$0xff]  }
  0x60   :  { %905 = vmatpush2.bf16.msra.mxu1 %v1412_v1  ;;  %865 = vmatprep.subr.bf16.mxu0 %v1413_v2  ;;  %v1510_v1 = vld [vmem:[#allocation5 + $0x32c] ss:$16 sps:$4 sm:$0xff]   ;;  %v1505_v2 = vld [vmem:[#allocation5 + $0x128] ss:$16 sps:$4 sm:$0xff]  }
  0x61   :  { %906 = vmatprep.subr.bf16.mxu1 %v1415_v3  ;;  %v1508_v3 = vld [vmem:[#allocation5 + $0x328] ss:$16 sps:$4 sm:$0xff]  }
  0x63   :  { %866 = vmatpush2.bf16.msra.mxu0 %v1417_v4  ;;  %v1513_v4 = vld [vmem:[#allocation5 + $0x10c] ss:$16 sps:$4 sm:$0xff]  }
  0x64   :  { %907 = vmatpush2.bf16.msra.mxu1 %v1418_v5  ;;  %917 = vmatprep.subr.bf16.mxu0 %v1423_v6  ;;  %v1516_v5 = vld [vmem:[#allocation5 + $0x30c] ss:$16 sps:$4 sm:$0xff]   ;;  %v1511_v6 = vld [vmem:[#allocation5 + $0x108] ss:$16 sps:$4 sm:$0xff]  }
  0x65   :  { %958 = vmatprep.subr.bf16.mxu1 %v1426_v7  ;;  %v1514_v7 = vld [vmem:[#allocation5 + $0x308] ss:$16 sps:$4 sm:$0xff]  }
  0x66   :  { %868 = vmatmul.mubr.bf16.vlgmr.msra.gmra.mxu0 %v1652_v8 }
  0x67   :  { %909 = vmatmul.mubr.bf16.vlgmr.msra.gmra.mxu1 %v1654_v9  ;;  %918 = vmatpush1.bf16.msra.mxu0 %v1421_v10 }
  0x68   :  { %959 = vmatpush1.bf16.msra.mxu1 %v1424_v11  ;;  %919 = vmatprep.subr.bf16.mxu0 %v1429_v12 }
  0x69   :  { %960 = vmatprep.subr.bf16.mxu1 %v1432_v13  ;;  %949 = vmatprep.mubr.bf16.mxu0 %v64_v54  ;;  %v1487_v54 = vld [vmem:[#allocation5 + $0x188] ss:$16 sps:$4 sm:$0xff]  }
  0x6a   :  { %990 = vmatprep.mubr.bf16.mxu1 %v66_v55  ;;  %v1490_v55 = vld [vmem:[#allocation5 + $0x388] ss:$16 sps:$4 sm:$0xff]  }
  0x6b   :  { %920 = vmatpush1.bf16.msra.mxu0 %v1427_v14 }
  0x6c   :  { %961 = vmatpush1.bf16.msra.mxu1 %v1430_v15  ;;  %921 = vmatprep.subr.bf16.mxu0 %v1435_v16 }
  0x6d   :  { %962 = vmatprep.subr.bf16.mxu1 %v1438_v17 }
  0x6f   :  { %922 = vmatpush1.bf16.msra.mxu0 %v1433_v18 }
  0x70   :  { %963 = vmatpush1.bf16.msra.mxu1 %v1436_v19  ;;  %923 = vmatprep.subr.bf16.mxu0 %v1441_v20 }
  0x71   :  { %964 = vmatprep.subr.bf16.mxu1 %v1444_v21 }
  0x73   :  { %924 = vmatpush1.bf16.msra.mxu0 %v1439_v22 }
  0x74   :  { %965 = vmatpush1.bf16.msra.mxu1 %v1442_v23  ;;  %925 = vmatprep.subr.bf16.mxu0 %v1447_v24 }
  0x75   :  { %966 = vmatprep.subr.bf16.mxu1 %v1450_v25 }
  0x77   :  { %926 = vmatpush1.bf16.msra.mxu0 %v1445_v26 }
  0x78   :  { %967 = vmatpush1.bf16.msra.mxu1 %v1448_v27  ;;  %927 = vmatprep.subr.bf16.mxu0 %v1453_v28 }
  0x79   :  { %968 = vmatprep.subr.bf16.mxu1 %v1456_v29 }
  0x7b   :  { %928 = vmatpush1.bf16.msra.mxu0 %v1451_v30 }
  0x7c   :  { %969 = vmatpush1.bf16.msra.mxu1 %v1454_v31  ;;  %929 = vmatprep.subr.bf16.mxu0 %v1459_v32 }
  0x7d   :  { %970 = vmatprep.subr.bf16.mxu1 %v1462_v33 }
  0x7f   :  { %930 = vmatpush1.bf16.msra.mxu0 %v1457_v34 }
  0x80   :  { %971 = vmatpush1.bf16.msra.mxu1 %v1460_v35  ;;  %931 = vmatprep.subr.bf16.mxu0 %v1465_v36 }
  0x81   :  { %972 = vmatprep.subr.bf16.mxu1 %v1468_v37 }
  0x83   :  { %932 = vmatpush1.bf16.msra.mxu0 %v1463_v38 }
  0x84   :  { %973 = vmatpush1.bf16.msra.mxu1 %v1466_v39  ;;  %933 = vmatprep.subr.bf16.mxu0 %v1471_v40 }
  0x85   :  { %974 = vmatprep.subr.bf16.mxu1 %v1474_v41 }
  0x87   :  { %934 = vmatpush2.bf16.msra.mxu0 %v1469_v42 }
  0x88   :  { %975 = vmatpush2.bf16.msra.mxu1 %v1472_v43  ;;  %935 = vmatprep.subr.bf16.mxu0 %v1477_v44 }
  0x89   :  { %976 = vmatprep.subr.bf16.mxu1 %v1480_v45 }
  0x8b   :  { %936 = vmatpush2.bf16.msra.mxu0 %v1475_v46 }
  0x8c   :  { %977 = vmatpush2.bf16.msra.mxu1 %v1478_v47  ;;  %937 = vmatprep.subr.bf16.mxu0 %v1483_v48 }
  0x8d   :  { %978 = vmatprep.subr.bf16.mxu1 %v1486_v49 }
  0x8f   :  { %938 = vmatpush2.bf16.msra.mxu0 %v1481_v50 }
  0x90   :  { %979 = vmatpush2.bf16.msra.mxu1 %v1484_v51  ;;  %939 = vmatprep.subr.bf16.mxu0 %v1489_v52 }
  0x91   :  { %980 = vmatprep.subr.bf16.mxu1 %v1492_v53 }
  0x93   :  { %940 = vmatpush2.bf16.msra.mxu0 %v1487_v54 }
  0x94   :  { %981 = vmatpush2.bf16.msra.mxu1 %v1490_v55  ;;  %941 = vmatprep.subr.bf16.mxu0 %v1495_v56 }
  0x95   :  { %982 = vmatprep.subr.bf16.mxu1 %v1498_v57 }
  0x97   :  { %942 = vmatpush2.bf16.msra.mxu0 %v1493_v58 }
  0x98   :  { %983 = vmatpush2.bf16.msra.mxu1 %v1496_v59  ;;  %943 = vmatprep.subr.bf16.mxu0 %v1501_v60 }
  0x99   :  { %984 = vmatprep.subr.bf16.mxu1 %v1504_v61 }
  0x9b   :  { %944 = vmatpush2.bf16.msra.mxu0 %v1499_v62 }
  0x9c   :  { %985 = vmatpush2.bf16.msra.mxu1 %v1502_v63  ;;  %945 = vmatprep.subr.bf16.mxu0 %v1507_v0 }
  0x9d   :  { %986 = vmatprep.subr.bf16.mxu1 %v1510_v1 }
  0x9f   :  { %946 = vmatpush2.bf16.msra.mxu0 %v1505_v2 }
  0xa0   :  { %987 = vmatpush2.bf16.msra.mxu1 %v1508_v3  ;;  %947 = vmatprep.subr.bf16.mxu0 %v1513_v4 }
  0xa1   :  { %988 = vmatprep.subr.bf16.mxu1 %v1516_v5 }
  0xa3   :  { %948 = vmatpush2.bf16.msra.mxu0 %v1511_v6 }
  0xa4   :  { %989 = vmatpush2.bf16.msra.mxu1 %v1514_v7 }
  0xa6   :  { %950 = vmatmul.mubr.bf16.vlgmr.msra.gmra.mxu0 %v1652_v8 }
  0xa7   :  { %991 = vmatmul.mubr.bf16.vlgmr.msra.gmra.mxu1 %v1654_v9 }
 0x126   :  { %v869_v10 = vpop.f32.mrf.mxu0 }
 0x127   :  { %v910_v11 = vpop.f32.mrf.mxu1 }
 0x128   :  { %v911_v12 = vadd.f32 %v910_v11, %v869_v10  ;;  %v871_v13 = vpop.f32.mrf.mxu0 }
 0x129   :  { %v912_v14 = vpop.f32.mrf.mxu1 }
 0x12a   :  { %v1000_v15 = vsel %vm999_vm0, %v911_v12, 0.0  ;;  %v913_v16 = vadd.f32 %v912_v14, %v871_v13  ;;  %v873_v18 = vpop.f32.mrf.mxu0 }
 0x12b   :  { %v1001_v17 = vrot.slane %v1000_v15, 4  ;;  %v914_v19 = vpop.f32.mrf.mxu1 }
 0x12c   :  { %v1007_v20 = vsel %vm999_vm0, %v913_v16, 0.0  ;;  %v874_v23 = vpop.f32.mrf.mxu0 }
 0x12d   :  { %v1002_v21 = vadd.f32 %v1001_v17, %v1000_v15  ;;  %v1008_v22 = vrot.slane %v1007_v20, 4  ;;  %v915_v8 = vpop.f32.mrf.mxu1 }
 0x12f   :  { %v1003_v24 = vrot.slane %v1002_v21, 2  ;;  %v1009_v9 = vadd.f32 %v1008_v22, %v1007_v20 }
 0x131   :  { %v1004_v25 = vadd.f32 %v1003_v24, %v1002_v21  ;;  %v1010_v26 = vrot.slane %v1009_v9, 2 }
 0x133   :  { %v1005_v27 = vrot.slane %v1004_v25, 1  ;;  %v1011_v28 = vadd.f32 %v1010_v26, %v1009_v9 }
 0x135   :  { %v1006_v29 = vadd.f32 %v1005_v27, %v1004_v25  ;;  %v1012_v30 = vrot.slane %v1011_v28, 1 }
 0x137   :  { %v1028_v31 = vmul.f32 0.25, %v1006_v29  ;;  %v1013_v32 = vadd.f32 %v1012_v30, %v1011_v28 }
 0x139   :  { %v1662_v33 = vsub.f32 %v911_v12, %v1028_v31  ;;  %v1029_v34 = vmul.f32 0.25, %v1013_v32 }
 0x13b   :  { %v1036_v35 = vmul.f32 %v1662_v33, %v1662_v33  ;;  %v1666_v36 = vsub.f32 %v913_v16, %v1029_v34 }
 0x13d   :  { %v1040_v37 = vsel %vm999_vm0, %v1036_v35, 0.0  ;;  %v1037_v38 = vmul.f32 %v1666_v36, %v1666_v36 }
 0x13e   :  { %v1041_v39 = vrot.slane %v1040_v37, 4 }
 0x13f   :  { %v1047_v40 = vsel %vm999_vm0, %v1037_v38, 0.0 }
 0x140   :  { %v1042_v41 = vadd.f32 %v1041_v39, %v1040_v37  ;;  %v1048_v42 = vrot.slane %v1047_v40, 4 }
 0x142   :  { %v1043_v43 = vrot.slane %v1042_v41, 2  ;;  %v1049_v44 = vadd.f32 %v1048_v42, %v1047_v40 }
 0x144   :  { %v1044_v45 = vadd.f32 %v1043_v43, %v1042_v41  ;;  %v1050_v46 = vrot.slane %v1049_v44, 2 }
 0x146   :  { %v1045_v47 = vrot.slane %v1044_v45, 1  ;;  %v1051_v48 = vadd.f32 %v1050_v46, %v1049_v44 }
 0x148   :  { %v1046_v49 = vadd.f32 %v1045_v47, %v1044_v45  ;;  %v1052_v50 = vrot.slane %v1051_v48, 1  ;;  %v1616_v45 = vmov 1966171168   ;;  %v1090_v47 = vlaneseq }
 0x149   :  { %v1088_v46 = vunpack.c.l.s4 %v1616_v45 }
 0x14a   :  { %v1068_v51 = vmul.f32 0.25, %v1046_v49  ;;  %v1053_v52 = vadd.f32 %v1052_v50, %v1051_v48  ;;  %v1091_v49 = vshrl.u32 %v1090_v47, 7 }
 0x14b   :  { %v1089_v48 = vunpack.c.0.s8 %v1088_v46 }
 0x14c   :  { %v1073_v53 = vadd.f32 1e-05, %v1068_v51  ;;  %v1069_v54 = vmul.f32 0.25, %v1053_v52 }
 0x14d   :  { %v1092_v51 = vsub.s32 %v1089_v48, %v1091_v49 }
 0x14e   :  { %v1074_v55 = vadd.f32 1e-05, %v1069_v54  ;;  %1517 = vrsqrt.f32 %v1073_v53 }
 0x150   :  { %1519 = vrsqrt.f32 %v1074_v55 }
 0x15b   :  { %v1672_v56 = vpop.eup %1517 }
 0x15d   :  { %v1520_v57 = vpop.eup %1519 }
 0x15e   :  { %v1085_v58 = vcombine.low %v1672_v56, %v1520_v57  ;;  %v1072_v57 = vld [vmem:[#allocation7] sm:$0xf] }
 0x160   :  { %v1093_v54 = vrot.slane %v1085_v58, %v1092_v51 }
 0x166   :  { %v951_v59 = vpop.f32.mrf.mxu0 }
 0x167   :  { %v992_v60 = vpop.f32.mrf.mxu1 }
 0x168   :  { %v993_v61 = vadd.f32 %v992_v60, %v951_v59  ;;  %v953_v62 = vpop.f32.mrf.mxu0  ;;  %v1126_v59 = vsub.s32 3, %v1091_v49 }
 0x169   :  { %v994_v63 = vpop.f32.mrf.mxu1 }
 0x16a   :  { %v1014_v0 = vsel %vm999_vm0, %v993_v61, 0.0  ;;  %v995_v1 = vadd.f32 %v994_v63, %v953_v62  ;;  %v955_v3 = vpop.f32.mrf.mxu0  ;;  %v1114_v62 = vsub.s32 0, %v1091_v49  ;;  %v1118_v63 = vsub.s32 1, %v1091_v49 }
 0x16b   :  { %v1015_v2 = vrot.slane %v1014_v0, 4  ;;  %v996_v4 = vpop.f32.mrf.mxu1 }
 0x16c   :  { %v1021_v5 = vsel %vm999_vm0, %v995_v1, 0.0  ;;  %v956_v10 = vpop.f32.mrf.mxu0 }
 0x16d   :  { %v1016_v6 = vadd.f32 %v1015_v2, %v1014_v0  ;;  %v1022_v7 = vrot.slane %v1021_v5, 4  ;;  %v997_v11 = vpop.f32.mrf.mxu1  ;;  %v1122_v0 = vsub.s32 2, %v1091_v49 }
 0x16f   :  { %v1017_v12 = vrot.slane %v1016_v6, 2  ;;  %v1023_v13 = vadd.f32 %v1022_v7, %v1021_v5 }
 0x171   :  { %v1018_v14 = vadd.f32 %v1017_v12, %v1016_v6  ;;  %v1024_v15 = vrot.slane %v1023_v13, 2 }
 0x173   :  { %v1019_v16 = vrot.slane %v1018_v14, 1  ;;  %v1025_v17 = vadd.f32 %v1024_v15, %v1023_v13 }
 0x175   :  { %v1020_v18 = vadd.f32 %v1019_v16, %v1018_v14  ;;  %v1026_v19 = vrot.slane %v1025_v17, 1 }
 0x177   :  { %v1030_v20 = vmul.f32 0.25, %v1020_v18  ;;  %v1027_v21 = vadd.f32 %v1026_v19, %v1025_v17 }
 0x179   :  { %v1034_v22 = vsub.f32 %v993_v61, %v1030_v20  ;;  %v1031_v23 = vmul.f32 0.25, %v1027_v21  ;;  %v1136_v61 = vld [vmem:[%s1690_s3] sm:$0xf]  ;;  %s1178_s3 = sshll.u32 %s1617_s5, 4  ;;  %s1179_s3 = int_to_ptr.vmem [resolvable:$true] %s1178_s3 }
 0x17a   :  { %v1153_v2 = vrot.slane %v1136_v61, %v1126_v59  ;;  %v1141_v3 = vrot.slane %v1136_v61, %v1114_v62  ;;  %v1145_v4 = vrot.slane %v1136_v61, %v1118_v63  ;;  %v1149_v5 = vrot.slane %v1136_v61, %v1122_v0  ;;  %s1585_s6 = scalar_lea.vmem %s1179_s3, 256  ;;  %p1590_p2 = scmp.lt.s32.totalorder %s1179_s3, %s1179_s3 }
 0x17b   :  { %v1038_v8 = vmul.f32 %v1034_v22, %v1034_v22  ;;  %v1035_v24 = vsub.f32 %v995_v1, %v1031_v23  ;;  %p1586_p1 = scmp.ne.s32.totalorder %s1179_s3, %s1585_s6  ;;  %p1591_p3 = scmp.lt.s32.totalorder %s1585_s6, %s1585_s6 }
 0x17d   :  { %v1054_v9 = vsel %vm999_vm0, %v1038_v8, 0.0  ;;  %v1039_v25 = vmul.f32 %v1035_v24, %v1035_v24  ;;  %p1592_p4 = por %p1591_p3, %p1590_p2 }
 0x17e   :  { %v1055_v26 = vrot.slane %v1054_v9, 4 }
 0x17f   :  { %v1061_v27 = vsel %vm999_vm0, %v1039_v25, 0.0  ;;  %p1593_p5 = pnand %p1592_p4, %p1586_p1 }
 0x180   :  { %v1056_v28 = vadd.f32 %v1055_v26, %v1054_v9  ;;  %v1062_v29 = vrot.slane %v1061_v27, 4 }
 0x182   :  { %v1057_v30 = vrot.slane %v1056_v28, 2  ;;  %v1063_v31 = vadd.f32 %v1062_v29, %v1061_v27 }
 0x184   :  { %v1058_v32 = vadd.f32 %v1057_v30, %v1056_v28  ;;  %v1064_v34 = vrot.slane %v1063_v31, 2 }
 0x186   :  { %v1059_v35 = vrot.slane %v1058_v32, 1  ;;  %v1065_v37 = vadd.f32 %v1064_v34, %v1063_v31 }
 0x188   :  { %v1060_v38 = vadd.f32 %v1059_v35, %v1058_v32  ;;  %v1066_v39 = vrot.slane %v1065_v37, 1 }
 0x18a   :  { %v1070_v40 = vmul.f32 0.25, %v1060_v38  ;;  %v1067_v41 = vadd.f32 %v1066_v39, %v1065_v37 }
 0x18c   :  { %v1075_v42 = vadd.f32 1e-05, %v1070_v40  ;;  %v1071_v43 = vmul.f32 0.25, %v1067_v41 }
 0x18e   :  { %v1076_v44 = vadd.f32 1e-05, %v1071_v43  ;;  %1521 = vrsqrt.f32 %v1075_v42 }
 0x190   :  { %1523 = vrsqrt.f32 %v1076_v44 }
 0x19b   :  { %v1522_v50 = vpop.eup %1521 }
 0x19d   :  { %v1524_v52 = vpop.eup %1523 }
 0x19e   :  { %v1086_v53 = vcombine.low %v1522_v50, %v1524_v52 }
 0x1a0   :  { %v1100_v55 = vrot.slane %v1086_v53, %v1092_v51 }
 0x1a2   :  { %v1101_v56 = vcombine.low %v1093_v54, %v1100_v55 }
 0x1a4   :  { %v1108_v60 = vrot.slane %v1101_v56, %v1092_v51 }
 0x1a6   :  { %v1110_v1 = vmul.f32 %v1108_v60, %v1072_v57 }
 0x1a8   :  { %v1127_v6 = vrot.slane %v1110_v1, %v1126_v59  ;;  %v1115_v7 = vrot.slane %v1110_v1, %v1114_v62  ;;  %v1119_v58 = vrot.slane %v1110_v1, %v1118_v63  ;;  %v1123_v10 = vrot.slane %v1110_v1, %v1122_v0 }
 0x1aa   :  { %v1135_v11 = vmul.f32 %v1127_v6, %v1035_v24  ;;  %v1132_v12 = vmul.f32 %v1115_v7, %v1662_v33  ;;  %v1133_v13 = vmul.f32 %v1119_v58, %v1666_v36  ;;  %v1134_v14 = vmul.f32 %v1123_v10, %v1034_v22 }
 0x1ac   :  { %v1161_v15 = vadd.f32 %v1153_v2, %v1135_v11  ;;  %v1158_v16 = vadd.f32 %v1141_v3, %v1132_v12  ;;  %v1159_v17 = vadd.f32 %v1145_v4, %v1133_v13  ;;  %v1160_v18 = vadd.f32 %v1149_v5, %v1134_v14 }
 0x1ae   :  { %v1166_v19 = vcombine.low %v1158_v16, %v1159_v17  ;;  %v1167_v20 = vcombine.low %v1160_v18, %v1161_v15 }
 0x1b0   :  { %1170 = vst [vmem:[#allocation8] sm:$0xff] %v1166_v19  ;;  %1171 = vst [vmem:[#allocation8 + $0x8] sm:$0xff] %v1167_v20 }
 0x1b1   :  { %1596 = shalt.err (!%p1593_p5)
}
 0x1b2   :  { %1181 = dma.vmem_to_hbm [thread:$0]  %s1179_s3, 256, %s1691_s4, [#allocation4]  }
 0x1b3   :  { %1609 = dma.done.wait [#allocation4], 256  }
 0x1b4   :  { %1610 = vsyncadd [#allocation4], 4294967040 }
 0x1b5   :  { %1185 = vsyncpa [#allocation3], 1 }
 0x1b6   :  { %1186 = vsyncpa [#allocation6], 1 }
 0x1b7   :  { %1187 = vsyncpa [#allocation4], 1 }

</bundles_post_ra>
